<compile_context>
chip_gen: v5e
topology: v5e:2x2
jax: 0.10.0
libtpu: 0.0.40
codegen_flags: <defaults>
</compile_context>

<pallas_src>
import jax
import jax.numpy as jnp
from jax.experimental import pallas as pl
from jax.experimental.pallas import tpu as pltpu

MATMUL_DTYPE = jnp.bfloat16   # MXU operand dtype (accumulation is always f32)


def _round_up(n, m):
    return ((n + m - 1) // m) * m


def _choose_chunk(T, max_chunk=8):
    """Largest divisor of T that is <= max_chunk (timesteps per grid step)."""
    for ct in range(min(T, max_chunk), 0, -1):
        if T % ct == 0:
            return ct
    return 1


def _choose_batch_tiling(B):
    """Sublane-aligned batch tile; prefer >=2 tiles so v7x megacore can split."""
    Bp = _round_up(B, 8)
    if Bp <= 8:
        return Bp, Bp
    TB = min(_round_up(-(-Bp // 2), 8), 256)
    Bp = _round_up(Bp, TB)
    return TB, Bp


# --------------------------------------------------------------------------- #
# Kernel
# --------------------------------------------------------------------------- #
def rnn_rollout_kernel(obs_ref, h0_ref,
                       w1_ref, b1_ref,
                       wgx_ref, wgh_ref, bg_ref,
                       wq_ref, bq_ref,
                       q_ref, h_seq_ref,
                       h_carry, hbf_carry):
    """One grid step = CT GRU timesteps for one batch tile.

    Weight index_maps are constant, so the weights stay VMEM-resident across
    all grid steps; the recurrent state is carried across time chunks in VMEM
    scratch (f32 master copy + bf16 copy reused as the MXU operand).
    """
    c = pl.program_id(1)
    Hp = h_carry.shape[-1]
    CT = obs_ref.shape[0]

    @pl.when(c == 0)
    def _():
        h_carry[...] = h0_ref[...]
        hbf_carry[...] = h0_ref[...].astype(hbf_carry.dtype)

    h = h_carry[...]        # (TB, Hp) f32 master copy of the hidden state
    h_bf = hbf_carry[...]   # (TB, Hp) bf16 copy used as MXU operand

    for ct in range(CT):    # static unroll over the time chunk
        # actionNet: x = relu(obs @ W1 + b1)
        obs = obs_ref[ct].astype(w1_ref.dtype)                     # (TB, d_in)
        x = jnp.dot(obs, w1_ref[...],
                    preferred_element_type=jnp.float32) + b1_ref[...]
        x = jnp.maximum(x, 0.0).astype(wgx_ref.dtype)              # (TB, Hp)

        # GRU gates: g = h @ Wg_h + x @ Wg_x + bg -> [r | z | i_n | h_n]
        # Two independent MXU pushes: the h-side one only depends on the
        # previous step, so it overlaps the obs->W1->ReLU chain above.
        g = (jnp.dot(h_bf, wgh_ref[...], preferred_element_type=jnp.float32)
             + jnp.dot(x, wgx_ref[...], preferred_element_type=jnp.float32)
             + bg_ref[...])                                        # (TB, 4*Hp)

        # Each gate occupies its own 128-lane block, so these slices are free.
        r = jax.nn.sigmoid(g[:, 0:Hp])
        z = jax.nn.sigmoid(g[:, Hp:2 * Hp])
        n = jnp.tanh(g[:, 2 * Hp:3 * Hp] + r * g[:, 3 * Hp:4 * Hp])
        h = (1.0 - z) * n + z * h                                  # f32
        h_bf = h.astype(hbf_carry.dtype)                           # single cast

        # qNet: q = h @ Wq + bq
        q = jnp.dot(h_bf, wq_ref[...],
                    preferred_element_type=jnp.float32) + bq_ref[...]

        q_ref[ct] = q.astype(q_ref.dtype)           # lane-dense (TB, Ap)
        h_seq_ref[ct] = h.astype(h_seq_ref.dtype)   # lane-dense (TB, Hp)

    h_carry[...] = h
    hbf_carry[...] = h_bf


# --------------------------------------------------------------------------- #
# Wrappers
# --------------------------------------------------------------------------- #
def rnn_rollout(obs_seq, h0, packed, max_chunk=8, out_dtype=jnp.float32):
    """obs_seq: (T, B, d_in), h0: (B, h).  Returns (q_seq (T,B,a), h_seq (T,B,h))."""
    d_in, h_dim, n_act, Hp, Ap = packed["dims"]
    T, B = obs_seq.shape[0], obs_seq.shape[1]

    CT = _choose_chunk(T, max_chunk)
    n_chunks = T // CT
    TB, Bp = _choose_batch_tiling(B)
    nb = Bp // TB
    mm_dtype = packed["wgh"].dtype

    # Only the batch axis is padded (cheap); features stay at d_in, so no padded
    # HBM copy of the observation tensor is built, and obs keeps its dtype (the
    # bf16 cast happens in-kernel on the tiny (TB, d_in) tile).
    if Bp != B:
        obs_p = jnp.zeros((T, Bp, d_in), obs_seq.dtype).at[:, :B, :].set(obs_seq)
    else:
        obs_p = obs_seq
    h0_p = jnp.zeros((Bp, Hp), jnp.float32).at[:B, :h_dim].set(
        h0.astype(jnp.float32))

    const = lambda b, c: (0, 0)
    grid_spec = pltpu.PrefetchScalarGridSpec(
        num_scalar_prefetch=0,
        grid=(nb, n_chunks),
        in_specs=[
            pl.BlockSpec((CT, TB, d_in), lambda b, c: (c, b, 0)),  # obs chunk
            pl.BlockSpec((TB, Hp), lambda b, c: (b, 0)),           # h0 tile
            pl.BlockSpec((d_in, Hp), const),                       # W1 (resident)
            pl.BlockSpec((1, Hp), const),                          # b1
            pl.BlockSpec((Hp, 4 * Hp), const),                     # Wg_x (resident)
            pl.BlockSpec((Hp, 4 * Hp), const),                     # Wg_h (resident)
            pl.BlockSpec((1, 4 * Hp), const),                      # bg
            pl.BlockSpec((Hp, Ap), const),                         # Wq (resident)
            pl.BlockSpec((1, Ap), const),                          # bq
        ],
        out_specs=(
            pl.BlockSpec((CT, TB, Ap), lambda b, c: (c, b, 0)),    # q chunk
            pl.BlockSpec((CT, TB, Hp), lambda b, c: (c, b, 0)),    # h chunk
        ),
        scratch_shapes=[
            pltpu.VMEM((TB, Hp), jnp.float32),   # recurrent carry (f32 master)
            pltpu.VMEM((TB, Hp), mm_dtype),      # recurrent carry (MXU operand)
        ],
    )

    q_p, h_p = pl.pallas_call(
        rnn_rollout_kernel,
        out_shape=(
            jax.ShapeDtypeStruct((T, Bp, Ap), out_dtype),
            jax.ShapeDtypeStruct((T, Bp, Hp), out_dtype),
        ),
        grid_spec=grid_spec,
        compiler_params=pltpu.CompilerParams(
            # batch tiles are independent (megacore on v7x); time is a recurrence
            dimension_semantics=("parallel", "arbitrary"),
        ),
    )(obs_p, h0_p,
      packed["w1"], packed["b1"],
      packed["wgx"], packed["wgh"], packed["bg"],
      packed["wq"], packed["bq"])

    return q_p[:, :B, :n_act], h_p[:, :B, :h_dim]


def rnn_forward(obs, hidden, packed):
    """Module-equivalent single step: obs (..., d_in), hidden (..., h) -> (q, h)."""
    d_in, h_dim = packed["dims"][0], packed["dims"][1]
    obs2 = obs.reshape(-1, d_in)
    h2 = hidden.reshape(-1, h_dim)
    q_seq, h_seq = rnn_rollout(obs2[None], h2, packed)
    return q_seq[0], h_seq[0]


# --------------------------------------------------------------------------- #
# Parameters (logical, PyTorch-transposed layout) and kernel packing
# --------------------------------------------------------------------------- #
def init_params(key, d_in, h_dim, n_act):
    """Deterministic synthetic params (PyTorch-like uniform init), (in, out) layout."""
    ks = jax.random.split(key, 8)

    def unif(k, shape, fan_in):
        bound = 1.0 / jnp.sqrt(jnp.float32(fan_in))
        return jax.random.uniform(k, shape, jnp.float32, -bound, bound)

    return {
        "w1": unif(ks[0], (d_in, h_dim), d_in),
        "b1": unif(ks[1], (1, h_dim), d_in),
        "w_ih": unif(ks[2], (h_dim, 3 * h_dim), h_dim),   # gate order [r | z | n]
        "b_ih": unif(ks[3], (1, 3 * h_dim), h_dim),
        "w_hh": unif(ks[4], (h_dim, 3 * h_dim), h_dim),
        "b_hh": unif(ks[5], (1, 3 * h_dim), h_dim),
        "wq": unif(ks[6], (h_dim, n_act), h_dim),
        "bq": unif(ks[7], (1, n_act), h_dim),
    }


def pack_params(params, dtype=MATMUL_DTYPE):
    """Pad hidden/action dims to 128-lane blocks and split the GRU gate weight
    into x-side and h-side matrices (biases pre-folded).

    Wg_x / Wg_h: (Hp, 4*Hp) with column blocks [r | z | i_n | h_n]; padded rows
    and columns are zero so the padded hidden lanes stay exactly zero through
    the recurrence.  d_in is NOT padded (obs keeps its true feature width).
    """
    d_in, h = params["w1"].shape
    a = params["wq"].shape[1]
    Hp, Ap = _round_up(h, 128), _round_up(a, 128)

    w1 = jnp.zeros((d_in, Hp), jnp.float32).at[:, :h].set(params["w1"])
    b1 = jnp.zeros((1, Hp), jnp.float32).at[:, :h].set(params["b1"])

    w_ih, w_hh = params["w_ih"], params["w_hh"]
    b_ih, b_hh = params["b_ih"], params["b_hh"]

    wgx = jnp.zeros((Hp, 4 * Hp), jnp.float32)
    wgh = jnp.zeros((Hp, 4 * Hp), jnp.float32)
    for g in range(3):                                    # x -> r, z, i_n
        wgx = wgx.at[:h, g * Hp:g * Hp + h].set(w_ih[:, g * h:(g + 1) * h])
    for g in range(2):                                    # h -> r, z
        wgh = wgh.at[:h, g * Hp:g * Hp + h].set(w_hh[:, g * h:(g + 1) * h])
    wgh = wgh.at[:h, 3 * Hp:3 * Hp + h].set(w_hh[:, 2 * h:3 * h])   # h -> h_n

    bg = jnp.zeros((1, 4 * Hp), jnp.float32)
    bg = bg.at[:, 0:h].set(b_ih[:, 0:h] + b_hh[:, 0:h])
    bg = bg.at[:, Hp:Hp + h].set(b_ih[:, h:2 * h] + b_hh[:, h:2 * h])
    bg = bg.at[:, 2 * Hp:2 * Hp + h].set(b_ih[:, 2 * h:3 * h])
    bg = bg.at[:, 3 * Hp:3 * Hp + h].set(b_hh[:, 2 * h:3 * h])

    wq = jnp.zeros((Hp, Ap), jnp.float32).at[:h, :a].set(params["wq"])
    bq = jnp.zeros((1, Ap), jnp.float32).at[:, :a].set(params["bq"])

    return {
        "w1": w1.astype(dtype), "b1": b1,
        "wgx": wgx.astype(dtype), "wgh": wgh.astype(dtype), "bg": bg,
        "wq": wq.astype(dtype), "bq": bq,
        "dims": (d_in, h, a, Hp, Ap),
    }


# --------------------------------------------------------------------------- #
# Pure-JAX references
# --------------------------------------------------------------------------- #
def _mm(a, b, mm_dtype):
    return jnp.dot(a.astype(mm_dtype), b.astype(mm_dtype),
                   preferred_element_type=jnp.float32)


def rnn_rollout_ref(obs_seq, h0, params, mm_dtype=jnp.float32):
    """mm_dtype=f32 -> exact module math; mm_dtype=bf16 -> matches kernel MXU rounding."""
    h_dim = params["w1"].shape[1]

    def step(h, obs):
        x = jnp.maximum(_mm(obs, params["w1"], mm_dtype) + params["b1"], 0.0)
        gi = _mm(x, params["w_ih"], mm_dtype) + params["b_ih"]
        gh = _mm(h, params["w_hh"], mm_dtype) + params["b_hh"]
        i_r, i_z, i_n = gi[:, :h_dim], gi[:, h_dim:2 * h_dim], gi[:, 2 * h_dim:]
        h_r, h_z, h_n = gh[:, :h_dim], gh[:, h_dim:2 * h_dim], gh[:, 2 * h_dim:]
        r = jax.nn.sigmoid(i_r + h_r)
        z = jax.nn.sigmoid(i_z + h_z)
        n = jnp.tanh(i_n + r * h_n)
        h_new = (1.0 - z) * n + z * h
        q = _mm(h_new, params["wq"], mm_dtype) + params["bq"]
        return h_new, (q, h_new)

    _, (q_seq, h_seq) = jax.lax.scan(step, h0.astype(jnp.float32),
                                     obs_seq.astype(jnp.float32))
    return q_seq, h_seq


# --------------------------------------------------------------------------- #
if __name__ == "__main__":
    # Shapes consistent with the module: input_shape=16, rnn_hidden=32,
    # n_actions=4, flattened batch = 2; rollout length T = 8 for the fused path.
    B, D_IN, H, A, T = 2, 16, 32, 4, 8

    key = jax.random.PRNGKey(0)
    k_obs, k_h, k_p, k_seq, k_obs2, k_h2 = jax.random.split(key, 6)

    params = init_params(k_p, D_IN, H, A)
    packed = pack_params(params)

    # ---- single step (module-equivalent forward) ----
    obs = jax.random.normal(k_obs, (B, D_IN), jnp.float32)
    hidden = jax.random.normal(k_h, (B, H), jnp.float32)
    q, h_out = rnn_forward(obs, hidden, packed)
    q = jax.block_until_ready(q)
    h_out = jax.block_until_ready(h_out)
    assert q.shape == (B, A) and h_out.shape == (B, H)

    q_m, h_m = rnn_rollout_ref(obs[None], hidden, params, mm_dtype=MATMUL_DTYPE)
    q_f, h_f = rnn_rollout_ref(obs[None], hidden, params, mm_dtype=jnp.float32)
    # tight check vs a reference with identical bf16 operand rounding
    assert jnp.allclose(q, q_m[0], atol=2e-3, rtol=2e-3)
    assert jnp.allclose(h_out, h_m[0], atol=2e-3, rtol=2e-3)
    # loose check vs pure-f32 module math
    assert jnp.allclose(q, q_f[0], atol=5e-2, rtol=5e-2)
    assert jnp.allclose(h_out, h_f[0], atol=5e-2, rtol=5e-2)

    # ---- fused T-step rollout (time-chunked grid, weights VMEM-resident) ----
    obs_seq = jax.random.normal(k_seq, (T, B, D_IN), jnp.float32)
    q_seq, h_seq = rnn_rollout(obs_seq, hidden, packed)
    q_seq = jax.block_until_ready(q_seq)
    h_seq = jax.block_until_ready(h_seq)
    assert q_seq.shape == (T, B, A) and h_seq.shape == (T, B, H)

    qs_m, hs_m = rnn_rollout_ref(obs_seq, hidden, params, mm_dtype=MATMUL_DTYPE)
    assert jnp.allclose(q_seq, qs_m, atol=5e-3, rtol=5e-3)
    assert jnp.allclose(h_seq, hs_m, atol=5e-3, rtol=5e-3)

    # ---- multi batch-tile + multi time-chunk path (carry across chunks) ----
    B2, T2 = 20, 12
    obs_seq2 = jax.random.normal(k_obs2, (T2, B2, D_IN), jnp.float32)
    hidden2 = jax.random.normal(k_h2, (B2, H), jnp.float32)
    q_seq2, h_seq2 = rnn_rollout(obs_seq2, hidden2, packed, max_chunk=8)
    q_seq2 = jax.block_until_ready(q_seq2)
    h_seq2 = jax.block_until_ready(h_seq2)
    assert q_seq2.shape == (T2, B2, A) and h_seq2.shape == (T2, B2, H)

    qs2_m, hs2_m = rnn_rollout_ref(obs_seq2, hidden2, params, mm_dtype=MATMUL_DTYPE)
    assert jnp.allclose(q_seq2, qs2_m, atol=5e-3, rtol=5e-3)
    assert jnp.allclose(h_seq2, hs2_m, atol=5e-3, rtol=5e-3)

    print("KERNEL_OK")
</pallas_src>

<mosaic_0001>
module attributes {stable_mosaic.version = 11 : i64} {
  func.func @rnn_rollout_kernel(%arg0: i32, %arg1: i32, %arg2: memref<1x8x16xf32, #tpu.memory_space<vmem>>, %arg3: memref<8x128xf32, #tpu.memory_space<vmem>>, %arg4: memref<16x128xbf16, #tpu.memory_space<vmem>>, %arg5: memref<1x128xf32, #tpu.memory_space<vmem>>, %arg6: memref<128x512xbf16, #tpu.memory_space<vmem>>, %arg7: memref<128x512xbf16, #tpu.memory_space<vmem>>, %arg8: memref<1x512xf32, #tpu.memory_space<vmem>>, %arg9: memref<128x128xbf16, #tpu.memory_space<vmem>>, %arg10: memref<1x128xf32, #tpu.memory_space<vmem>>, %arg11: memref<1x8x128xf32, #tpu.memory_space<vmem>>, %arg12: memref<1x8x128xf32, #tpu.memory_space<vmem>>, %arg13: memref<8x128xf32, #tpu.memory_space<vmem>>, %arg14: memref<8x128xbf16, #tpu.memory_space<vmem>>) attributes {dimension_semantics = [#tpu.dimension_semantics<parallel>, #tpu.dimension_semantics<arbitrary>], iteration_bounds = array<i64: 1, 1>, scalar_prefetch = 0 : i64, scratch_operands = 2 : i64, tpu.core_type = #tpu.core_type<tc>, window_params = [{transform_indices = @transform_0, window_bounds = array<i64: 1, 8, 16>}, {transform_indices = @transform_1, window_bounds = array<i64: 8, 128>}, {pipeline_mode = #tpu.pipeline_mode<synchronous>, transform_indices = @transform_2, window_bounds = array<i64: 16, 128>}, {pipeline_mode = #tpu.pipeline_mode<synchronous>, transform_indices = @transform_3, window_bounds = array<i64: 1, 128>}, {pipeline_mode = #tpu.pipeline_mode<synchronous>, transform_indices = @transform_4, window_bounds = array<i64: 128, 512>}, {pipeline_mode = #tpu.pipeline_mode<synchronous>, transform_indices = @transform_5, window_bounds = array<i64: 128, 512>}, {pipeline_mode = #tpu.pipeline_mode<synchronous>, transform_indices = @transform_6, window_bounds = array<i64: 1, 512>}, {pipeline_mode = #tpu.pipeline_mode<synchronous>, transform_indices = @transform_7, window_bounds = array<i64: 128, 128>}, {pipeline_mode = #tpu.pipeline_mode<synchronous>, transform_indices = @transform_8, window_bounds = array<i64: 1, 128>}, {transform_indices = @transform_9, window_bounds = array<i64: 1, 8, 128>}, {transform_indices = @transform_10, window_bounds = array<i64: 1, 8, 128>}]} {
    %c0_i32 = arith.constant 0 : i32
    %0 = arith.cmpi eq, %arg1, %c0_i32 : i32
    %1 = arith.extui %0 : i1 to i32
    %c0_i32_0 = arith.constant 0 : i32
    %2 = arith.cmpi ne, %1, %c0_i32_0 : i32
    scf.if %2 {
      %c0_38 = arith.constant 0 : index
      %c0_39 = arith.constant 0 : index
      %60 = vector.load %arg3[%c0_38, %c0_39] : memref<8x128xf32, #tpu.memory_space<vmem>>, vector<8x128xf32>
      %c0_40 = arith.constant 0 : index
      %c0_41 = arith.constant 0 : index
      %61 = vector.load %arg13[%c0_40, %c0_41] : memref<8x128xf32, #tpu.memory_space<vmem>>, vector<8x128xf32>
      tpu.vector_store %arg13[%c0_40, %c0_41], %60 {strides = array<i32>} : memref<8x128xf32, #tpu.memory_space<vmem>>, vector<8x128xf32>,
      %c0_42 = arith.constant 0 : index
      %c0_43 = arith.constant 0 : index
      %62 = vector.load %arg3[%c0_42, %c0_43] : memref<8x128xf32, #tpu.memory_space<vmem>>, vector<8x128xf32>
      %63 = arith.truncf %62 : vector<8x128xf32> to vector<8x128xbf16>
      %c0_44 = arith.constant 0 : index
      %c0_45 = arith.constant 0 : index
      %64 = vector.load %arg14[%c0_44, %c0_45] : memref<8x128xbf16, #tpu.memory_space<vmem>>, vector<8x128xbf16>
      tpu.vector_store %arg14[%c0_44, %c0_45], %63 {strides = array<i32>} : memref<8x128xbf16, #tpu.memory_space<vmem>>, vector<8x128xbf16>,
    } else {
    }
    %c0 = arith.constant 0 : index
    %c0_1 = arith.constant 0 : index
    %3 = vector.load %arg13[%c0, %c0_1] : memref<8x128xf32, #tpu.memory_space<vmem>>, vector<8x128xf32>
    %c0_2 = arith.constant 0 : index
    %c0_3 = arith.constant 0 : index
    %4 = vector.load %arg14[%c0_2, %c0_3] : memref<8x128xbf16, #tpu.memory_space<vmem>>, vector<8x128xbf16>
    %c0_4 = arith.constant 0 : index
    %c0_5 = arith.constant 0 : index
    %c0_6 = arith.constant 0 : index
    %5 = vector.load %arg2[%c0_4, %c0_5, %c0_6] : memref<1x8x16xf32, #tpu.memory_space<vmem>>, vector<1x8x16xf32>
    %6 = vector.shape_cast %5 : vector<1x8x16xf32> to vector<8x16xf32>
    %7 = arith.truncf %6 : vector<8x16xf32> to vector<8x16xbf16>
    %c0_7 = arith.constant 0 : index
    %c0_8 = arith.constant 0 : index
    %8 = vector.load %arg4[%c0_7, %c0_8] : memref<16x128xbf16, #tpu.memory_space<vmem>>, vector<16x128xbf16>
    %cst = arith.constant dense<0.000000e+00> : vector<8x128xf32>
    %9 = tpu.matmul %7, %8, %cst {dimension_numbers = #tpu.dot_dimension_numbers<[1], [0], [0], [1], [0, 0, 1, 1], [], []>} : vector<8x16xbf16>, vector<16x128xbf16>, vector<8x128xf32> -> vector<8x128xf32>
    %c0_9 = arith.constant 0 : index
    %c0_10 = arith.constant 0 : index
    %10 = vector.load %arg5[%c0_9, %c0_10] : memref<1x128xf32, #tpu.memory_space<vmem>>, vector<1x128xf32>
    %11 = vector.broadcast %10 : vector<1x128xf32> to vector<8x128xf32>
    %12 = arith.addf %9, %11 : vector<8x128xf32>
    %cst_11 = arith.constant 0.000000e+00 : f32
    %13 = vector.broadcast %cst_11 : f32 to vector<8x128xf32>
    %14 = arith.maximumf %12, %13 : vector<8x128xf32>
    %15 = arith.truncf %14 : vector<8x128xf32> to vector<8x128xbf16>
    %c0_12 = arith.constant 0 : index
    %c0_13 = arith.constant 0 : index
    %16 = vector.load %arg7[%c0_12, %c0_13] : memref<128x512xbf16, #tpu.memory_space<vmem>>, vector<128x512xbf16>
    %cst_14 = arith.constant dense<0.000000e+00> : vector<8x512xf32>
    %17 = tpu.matmul %4, %16, %cst_14 {dimension_numbers = #tpu.dot_dimension_numbers<[1], [0], [0], [1], [0, 0, 1, 1], [], []>} : vector<8x128xbf16>, vector<128x512xbf16>, vector<8x512xf32> -> vector<8x512xf32>
    %c0_15 = arith.constant 0 : index
    %c0_16 = arith.constant 0 : index
    %18 = vector.load %arg6[%c0_15, %c0_16] : memref<128x512xbf16, #tpu.memory_space<vmem>>, vector<128x512xbf16>
    %cst_17 = arith.constant dense<0.000000e+00> : vector<8x512xf32>
    %19 = tpu.matmul %15, %18, %cst_17 {dimension_numbers = #tpu.dot_dimension_numbers<[1], [0], [0], [1], [0, 0, 1, 1], [], []>} : vector<8x128xbf16>, vector<128x512xbf16>, vector<8x512xf32> -> vector<8x512xf32>
    %20 = arith.addf %17, %19 : vector<8x512xf32>
    %c0_18 = arith.constant 0 : index
    %c0_19 = arith.constant 0 : index
    %21 = vector.load %arg8[%c0_18, %c0_19] : memref<1x512xf32, #tpu.memory_space<vmem>>, vector<1x512xf32>
    %22 = vector.broadcast %21 : vector<1x512xf32> to vector<8x512xf32>
    %23 = arith.addf %20, %22 : vector<8x512xf32>
    %24 = vector.extract_strided_slice %23 {offsets = [0, 0], sizes = [8, 128], strides = [1, 1]} : vector<8x512xf32> to vector<8x128xf32>
    %25 = arith.negf %24 : vector<8x128xf32>
    %26 = math.exp %25 : vector<8x128xf32>
    %cst_20 = arith.constant 1.000000e+00 : f32
    %27 = vector.broadcast %cst_20 : f32 to vector<8x128xf32>
    %28 = arith.addf %27, %26 : vector<8x128xf32>
    %29 = arith.divf %27, %28 : vector<8x128xf32>
    %30 = vector.extract_strided_slice %23 {offsets = [0, 128], sizes = [8, 128], strides = [1, 1]} : vector<8x512xf32> to vector<8x128xf32>
    %31 = arith.negf %30 : vector<8x128xf32>
    %32 = math.exp %31 : vector<8x128xf32>
    %cst_21 = arith.constant 1.000000e+00 : f32
    %33 = vector.broadcast %cst_21 : f32 to vector<8x128xf32>
    %34 = arith.addf %33, %32 : vector<8x128xf32>
    %35 = arith.divf %33, %34 : vector<8x128xf32>
    %36 = vector.extract_strided_slice %23 {offsets = [0, 256], sizes = [8, 128], strides = [1, 1]} : vector<8x512xf32> to vector<8x128xf32>
    %37 = vector.extract_strided_slice %23 {offsets = [0, 384], sizes = [8, 128], strides = [1, 1]} : vector<8x512xf32> to vector<8x128xf32>
    %38 = arith.mulf %29, %37 : vector<8x128xf32>
    %39 = arith.addf %36, %38 : vector<8x128xf32>
    %40 = math.tanh %39 : vector<8x128xf32>
    %cst_22 = arith.constant 1.000000e+00 : f32
    %41 = vector.broadcast %cst_22 : f32 to vector<8x128xf32>
    %42 = arith.subf %41, %35 : vector<8x128xf32>
    %43 = arith.mulf %42, %40 : vector<8x128xf32>
    %44 = arith.mulf %35, %3 : vector<8x128xf32>
    %45 = arith.addf %43, %44 : vector<8x128xf32>
    %46 = arith.truncf %45 : vector<8x128xf32> to vector<8x128xbf16>
    %c0_23 = arith.constant 0 : index
    %c0_24 = arith.constant 0 : index
    %47 = vector.load %arg9[%c0_23, %c0_24] : memref<128x128xbf16, #tpu.memory_space<vmem>>, vector<128x128xbf16>
    %cst_25 = arith.constant dense<0.000000e+00> : vector<8x128xf32>
    %48 = tpu.matmul %46, %47, %cst_25 {dimension_numbers = #tpu.dot_dimension_numbers<[1], [0], [0], [1], [0, 0, 1, 1], [], []>} : vector<8x128xbf16>, vector<128x128xbf16>, vector<8x128xf32> -> vector<8x128xf32>
    %c0_26 = arith.constant 0 : index
    %c0_27 = arith.constant 0 : index
    %49 = vector.load %arg10[%c0_26, %c0_27] : memref<1x128xf32, #tpu.memory_space<vmem>>, vector<1x128xf32>
    %50 = vector.broadcast %49 : vector<1x128xf32> to vector<8x128xf32>
    %51 = arith.addf %48, %50 : vector<8x128xf32>
    %c0_28 = arith.constant 0 : index
    %c0_29 = arith.constant 0 : index
    %c0_30 = arith.constant 0 : index
    %52 = vector.load %arg11[%c0_28, %c0_29, %c0_30] : memref<1x8x128xf32, #tpu.memory_space<vmem>>, vector<1x8x128xf32>
    %53 = vector.shape_cast %52 : vector<1x8x128xf32> to vector<8x128xf32>
    %54 = vector.shape_cast %51 : vector<8x128xf32> to vector<1x8x128xf32>
    tpu.vector_store %arg11[%c0_28, %c0_29, %c0_30], %54 {strides = array<i32>} : memref<1x8x128xf32, #tpu.memory_space<vmem>>, vector<1x8x128xf32>,
    %c0_31 = arith.constant 0 : index
    %c0_32 = arith.constant 0 : index
    %c0_33 = arith.constant 0 : index
    %55 = vector.load %arg12[%c0_31, %c0_32, %c0_33] : memref<1x8x128xf32, #tpu.memory_space<vmem>>, vector<1x8x128xf32>
    %56 = vector.shape_cast %55 : vector<1x8x128xf32> to vector<8x128xf32>
    %57 = vector.shape_cast %45 : vector<8x128xf32> to vector<1x8x128xf32>
    tpu.vector_store %arg12[%c0_31, %c0_32, %c0_33], %57 {strides = array<i32>} : memref<1x8x128xf32, #tpu.memory_space<vmem>>, vector<1x8x128xf32>,
    %c0_34 = arith.constant 0 : index
    %c0_35 = arith.constant 0 : index
    %58 = vector.load %arg13[%c0_34, %c0_35] : memref<8x128xf32, #tpu.memory_space<vmem>>, vector<8x128xf32>
    tpu.vector_store %arg13[%c0_34, %c0_35], %45 {strides = array<i32>} : memref<8x128xf32, #tpu.memory_space<vmem>>, vector<8x128xf32>,
    %c0_36 = arith.constant 0 : index
    %c0_37 = arith.constant 0 : index
    %59 = vector.load %arg14[%c0_36, %c0_37] : memref<8x128xbf16, #tpu.memory_space<vmem>>, vector<8x128xbf16>
    tpu.vector_store %arg14[%c0_36, %c0_37], %46 {strides = array<i32>} : memref<8x128xbf16, #tpu.memory_space<vmem>>, vector<8x128xbf16>,
    return
  }
  func.func @transform_0(%arg0: i32, %arg1: i32) -> (i32, i32, i32) {
    %c0_i32 = arith.constant 0 : i32
    %c0_i32_0 = arith.constant 0 : i32
    return %arg1, %arg0, %c0_i32 : i32, i32, i32
  }
  func.func @transform_1(%arg0: i32, %arg1: i32) -> (i32, i32) {
    %c0_i32 = arith.constant 0 : i32
    %c0_i32_0 = arith.constant 0 : i32
    return %arg0, %c0_i32 : i32, i32
  }
  func.func @transform_2(%arg0: i32, %arg1: i32) -> (i32, i32) {
    %c0_i32 = arith.constant 0 : i32
    %c0_i32_0 = arith.constant 0 : i32
    %c0_i32_1 = arith.constant 0 : i32
    return %c0_i32, %c0_i32_0 : i32, i32
  }
  func.func @transform_3(%arg0: i32, %arg1: i32) -> (i32, i32) {
    %c0_i32 = arith.constant 0 : i32
    %c0_i32_0 = arith.constant 0 : i32
    %c0_i32_1 = arith.constant 0 : i32
    return %c0_i32, %c0_i32_0 : i32, i32
  }
  func.func @transform_4(%arg0: i32, %arg1: i32) -> (i32, i32) {
    %c0_i32 = arith.constant 0 : i32
    %c0_i32_0 = arith.constant 0 : i32
    %c0_i32_1 = arith.constant 0 : i32
    return %c0_i32, %c0_i32_0 : i32, i32
  }
  func.func @transform_5(%arg0: i32, %arg1: i32) -> (i32, i32) {
    %c0_i32 = arith.constant 0 : i32
    %c0_i32_0 = arith.constant 0 : i32
    %c0_i32_1 = arith.constant 0 : i32
    return %c0_i32, %c0_i32_0 : i32, i32
  }
  func.func @transform_6(%arg0: i32, %arg1: i32) -> (i32, i32) {
    %c0_i32 = arith.constant 0 : i32
    %c0_i32_0 = arith.constant 0 : i32
    %c0_i32_1 = arith.constant 0 : i32
    return %c0_i32, %c0_i32_0 : i32, i32
  }
  func.func @transform_7(%arg0: i32, %arg1: i32) -> (i32, i32) {
    %c0_i32 = arith.constant 0 : i32
    %c0_i32_0 = arith.constant 0 : i32
    %c0_i32_1 = arith.constant 0 : i32
    return %c0_i32, %c0_i32_0 : i32, i32
  }
  func.func @transform_8(%arg0: i32, %arg1: i32) -> (i32, i32) {
    %c0_i32 = arith.constant 0 : i32
    %c0_i32_0 = arith.constant 0 : i32
    %c0_i32_1 = arith.constant 0 : i32
    return %c0_i32, %c0_i32_0 : i32, i32
  }
  func.func @transform_9(%arg0: i32, %arg1: i32) -> (i32, i32, i32) {
    %c0_i32 = arith.constant 0 : i32
    %c0_i32_0 = arith.constant 0 : i32
    return %arg1, %arg0, %c0_i32 : i32, i32, i32
  }
  func.func @transform_10(%arg0: i32, %arg1: i32) -> (i32, i32, i32) {
    %c0_i32 = arith.constant 0 : i32
    %c0_i32_0 = arith.constant 0 : i32
    return %arg1, %arg0, %c0_i32 : i32, i32, i32
  }
}

</mosaic_0001>

<bundles_post_ra>
// kernel: tpu_custom_call.1
= control target key start
LH: loop header
LB: loop body
LE: loop exit
PB: predicated region body
PF: predicated region fallthrough
CT: control target
= control target key end

     0   :  { %16 = vsyncpa [#allocation5], 0  ;;  %s1542_s0 = inlined_call_operand.hbm [shape: f32[1,8,16], index: 0, kind: input, shape index: {}]   ;;  %s1543_s1 = inlined_call_operand.hbm [shape: f32[8,128], index: 1, kind: input, shape index: {}]   ;;  %s1544_s2 = inlined_call_operand.hbm [shape: bf16[16,128], index: 2, kind: input, shape index: {}]   ;;  %s1545_s3 = inlined_call_operand.vmem [shape: f32[1,128], index: 3, kind: input, shape index: {}]   ;;  %s1546_s4 = inlined_call_operand.hbm [shape: bf16[128,512], index: 4, kind: input, shape index: {}]   ;;  %s1547_s5 = inlined_call_operand.hbm [shape: bf16[128,512], index: 5, kind: input, shape index: {}]   ;;  %s1548_s6 = inlined_call_operand.vmem [shape: f32[1,512], index: 6, kind: input, shape index: {}]   ;;  %s1549_s7 = inlined_call_operand.hbm [shape: bf16[128,128], index: 7, kind: input, shape index: {}]   ;;  %s1550_s8 = inlined_call_operand.vmem [shape: f32[1,128], index: 8, kind: input, shape index: {}]   ;;  %s1551_s9 = inlined_call_operand.hbm [shape: f32[1,8,128], index: 9, kind: output, shape index: {0}]   ;;  %s1552_s10 = inlined_call_operand.hbm [shape: f32[1,8,128], index: 10, kind: output, shape index: {1}]  }
   0x1   :  { %17 = vsyncpa [#allocation8], 0 }
   0x2   :  { %18 = vsyncpa [#allocation11], 0 }
   0x3   :  { %19 = vsyncpa [#allocation14], 0 }
   0x4   :  { %20 = vsyncpa [#allocation6], 0  ;;  %s38_s15 = sshll.u32 %s1543_s1, 4  ;;  %s39_s15 = int_to_ptr.hbm [resolvable:$true] %s38_s15 }
   0x5   :  { %21 = vsyncpa [#allocation17], 0  ;;  %s1436_s16 = smov [#allocation7]   ;;  %s63_s20 = sshll.u32 %s1546_s4, 4  ;;  %s64_s20 = int_to_ptr.hbm [resolvable:$true] %s63_s20 }
   0x6   :  { %s40_s17 = sshll.u32 %s1436_s16, 4  ;;  %s1437_s21 = smov [#allocation10]   ;;  %s41_s17 = int_to_ptr.vmem [resolvable:$true] %s40_s17 }
   0x7   :  { %43 = dma.hbm_to_vmem [thread:$0]  %s39_s15, 128, %s41_s17, [#allocation8]  }
   0x8   :  { %s65_s22 = sshll.u32 %s1437_s21, 4  ;;  %s1438_s23 = smov 256   ;;  %s66_s22 = int_to_ptr.vmem [resolvable:$true] %s65_s22 }
   0x9   :  { %s1439_s24 = smov 16   ;;  %s27_s1 = sshll.u32 %s1542_s0, 4  ;;  %s28_s1 = int_to_ptr.hbm [resolvable:$true] %s27_s1 }
   0xa   :  { %71 = dma.hbm_to_vmem [thread:$0]  %s64_s20, 4096, %s66_s22, [#allocation11], %s1438_s23, %s1438_s23, %s1439_s24  }
   0xb   :  { %s1440_s27 = smov [#allocation4]   ;;  %s48_s4 = sshll.u32 %s1544_s2, 4  ;;  %s49_s4 = int_to_ptr.hbm [resolvable:$true] %s48_s4 }
   0xc   :  { %s29_s28 = sshll.u32 %s1440_s27, 4  ;;  %s1441_s11 = smov [#allocation9]   ;;  %s30_s28 = int_to_ptr.vmem [resolvable:$true] %s29_s28 }
   0xd   :  { %32 = dma.hbm_to_vmem [thread:$0]  %s28_s1, 128, %s30_s28, [#allocation5]  }
   0xe   :  { %s50_s12 = sshll.u32 %s1441_s11, 4  ;;  %s1442_s13 = smov 64   ;;  %s51_s12 = int_to_ptr.vmem [resolvable:$true] %s50_s12 }
   0xf   :  { %s1443_s14 = smov 4   ;;  %s76_s0 = sshll.u32 %s1547_s5, 4  ;;  %s77_s0 = int_to_ptr.hbm [resolvable:$true] %s76_s0 }
  0x10   :  { %56 = dma.hbm_to_vmem [thread:$0]  %s49_s4, 128, %s51_s12, [#allocation8], %s1442_s13, %s1442_s13, %s1443_s14  }
  0x11   :  { %s1444_s17 = smov [#allocation12]   ;;  %s91_s2 = sshll.u32 %s1549_s7, 4  ;;  %s92_s2 = int_to_ptr.hbm [resolvable:$true] %s91_s2 }
  0x12   :  { %s78_s18 = sshll.u32 %s1444_s17, 4  ;;  %s1445_s21 = smov [#allocation13]   ;;  %s79_s18 = int_to_ptr.vmem [resolvable:$true] %s78_s18 }
  0x13   :  { %84 = dma.hbm_to_vmem [thread:$0]  %s77_s0, 4096, %s79_s18, [#allocation11], %s1438_s23, %s1438_s23, %s1439_s24  }
  0x14   :  { %s93_s22 = sshll.u32 %s1445_s21, 4  ;;  %s94_s22 = int_to_ptr.vmem [resolvable:$true] %s93_s22 }
  0x15   :  { %99 = dma.hbm_to_vmem [thread:$0]  %s92_s2, 1024, %s94_s22, [#allocation14], %s1442_s13, %s1442_s13, %s1443_s14  }
  0x16   :  { %1424 = dma.done.wait [#allocation5], 128  }
  0x17   :  { %1425 = vsyncadd [#allocation5], 4294967168 }
  0x18   :  { %1426 = dma.done.wait [#allocation8], 256  }
  0x19   :  { %1427 = vsyncadd [#allocation8], 4294967040 }
  0x1a   :  { %1428 = dma.done.wait [#allocation11], 8192  }
  0x1b   :  { %1429 = vsyncadd [#allocation11], 4294959104 }
  0x1c   :  { %1430 = dma.done.wait [#allocation14], 1024  }
  0x1d   :  { %1431 = vsyncadd [#allocation14], 4294966272  ;;  %v1135_v0 = vld [vmem:[#allocation9] sm:$0xff]  ;;  %v138_v1 = vld [vmem:[#allocation4] sm:$0xff]  ;;  %vm152_vm0 = vcmask 130048   ;;  %s822_s1 = sshll.u32 %s1552_s10, 4  ;;  %s823_s1 = int_to_ptr.hbm [resolvable:$true] %s822_s1 }
  0x1e   :  { %v959_v2 = vld [vmem:[#allocation10 + $0xe0] sm:$0xf]  ;;  %v139_v3 = vpack.c.bf16 %v138_v1, %v138_v1  ;;  %v1198_v4 = vld [vmem:[#allocation10 + $0xec] sm:$0xf0]  ;;  %v1196_v5 = vld [vmem:[#allocation10 + $0xe4] sm:$0xf]  ;;  %163 = vmatpush.bf16.msra.mxu0 %v1135_v0 }
  0x1f   :  { %v961_v6 = vld [vmem:[#allocation10 + $0xf0] sm:$0xf0]  ;;  %v960_v7 = vor.u32 %v1198_v4, %v959_v2  ;;  %v967_v9 = vld [vmem:[#allocation10 + $0xe8] sm:$0xf]  ;;  %v1199_v10 = vld [vmem:[#allocation10 + $0xf4] sm:$0xf0] }
  0x20   :  { %v964_v8 = vor.u32 %v1196_v5, %v961_v6  ;;  %v1197_v11 = vld [vmem:[#allocation10 + $0xec] sm:$0xf]  ;;  %v968_v12 = vor.u32 %v1199_v10, %v967_v9  ;;  %v969_v13 = vld [vmem:[#allocation10 + $0xf8] sm:$0xf0]  ;;  %v943_v14 = vld [vmem:[#allocation10 + $0xc0] sm:$0xf] }
  0x21   :  { %v1194_v15 = vld [vmem:[#allocation10 + $0xcc] sm:$0xf0]  ;;  %395 = vmatpush.bf16.msra.mxu1 %v960_v7  ;;  %v972_v16 = vor.u32 %v1197_v11, %v969_v13  ;;  %v1192_v18 = vld [vmem:[#allocation10 + $0xc4] sm:$0xf]  ;;  %v945_v19 = vld [vmem:[#allocation10 + $0xd0] sm:$0xf0]  ;;  %844 = vmatmul.msk.bf16.vlgmr.msra.gmra.mxu0 %vm152_vm0, %v139_v3 }
  0x22   :  { %408 = vmatpush.bf16.msra.mxu2 %v964_v8  ;;  %v944_v17 = vor.u32 %v1194_v15, %v943_v14  ;;  %v951_v20 = vld [vmem:[#allocation10 + $0xc8] sm:$0xf]  ;;  %421 = vmatpush.bf16.msra.mxu3 %v968_v12  ;;  %v948_v21 = vor.u32 %v1192_v18, %v945_v19  ;;  %v1195_v22 = vld [vmem:[#allocation10 + $0xd4] sm:$0xf0]  ;;  %v1193_v23 = vld [vmem:[#allocation10 + $0xcc] sm:$0xf] }
  0x23   :  { %v953_v24 = vld [vmem:[#allocation10 + $0xd8] sm:$0xf0]  ;;  %434 = vmatpush.bf16.msrb.mxu0 %v972_v16  ;;  %v952_v25 = vor.u32 %v1195_v22, %v951_v20  ;;  %v927_v27 = vld [vmem:[#allocation10 + $0xa0] sm:$0xf]  ;;  %v1190_v28 = vld [vmem:[#allocation10 + $0xac] sm:$0xf0] }
  0x24   :  { %v956_v26 = vor.u32 %v1193_v23, %v953_v24  ;;  %v1188_v29 = vld [vmem:[#allocation10 + $0xa4] sm:$0xf]  ;;  %v929_v30 = vld [vmem:[#allocation10 + $0xb0] sm:$0xf0]  ;;  %v935_v31 = vld [vmem:[#allocation10 + $0xa8] sm:$0xf]  ;;  %v928_v33 = vor.u32 %v1190_v28, %v927_v27 }
  0x25   :  { %v1191_v32 = vld [vmem:[#allocation10 + $0xb4] sm:$0xf0]  ;;  %396 = vmatpush.bf16.msra.mxu1 %v944_v17  ;;  %v932_v34 = vor.u32 %v1188_v29, %v929_v30  ;;  %v1189_v35 = vld [vmem:[#allocation10 + $0xac] sm:$0xf]  ;;  %v937_v36 = vld [vmem:[#allocation10 + $0xb8] sm:$0xf0] }
  0x26   :  { %409 = vmatpush.bf16.msra.mxu2 %v948_v21  ;;  %v911_v37 = vld [vmem:[#allocation10 + $0x80] sm:$0xf]  ;;  %422 = vmatpush.bf16.msra.mxu3 %v952_v25  ;;  %v936_v38 = vor.u32 %v1191_v32, %v935_v31  ;;  %v1186_v39 = vld [vmem:[#allocation10 + $0x8c] sm:$0xf0]  ;;  %v1184_v40 = vld [vmem:[#allocation10 + $0x84] sm:$0xf]  ;;  %v940_v42 = vor.u32 %v1189_v35, %v937_v36 }
  0x27   :  { %v913_v41 = vld [vmem:[#allocation10 + $0x90] sm:$0xf0]  ;;  %435 = vmatpush.bf16.msrb.mxu0 %v956_v26  ;;  %v919_v43 = vld [vmem:[#allocation10 + $0x88] sm:$0xf]  ;;  %v1187_v44 = vld [vmem:[#allocation10 + $0x94] sm:$0xf0]  ;;  %v912_v47 = vor.u32 %v1186_v39, %v911_v37 }
  0x28   :  { %v1185_v45 = vld [vmem:[#allocation10 + $0x8c] sm:$0xf]  ;;  %v921_v46 = vld [vmem:[#allocation10 + $0x98] sm:$0xf0]  ;;  %v916_v48 = vor.u32 %v1184_v40, %v913_v41  ;;  %v895_v49 = vld [vmem:[#allocation10 + $0x60] sm:$0xf]  ;;  %v920_v50 = vor.u32 %v1187_v44, %v919_v43 }
  0x29   :  { %397 = vmatpush.bf16.msra.mxu1 %v928_v33  ;;  %v1182_v51 = vld [vmem:[#allocation10 + $0x6c] sm:$0xf0]  ;;  %v1180_v52 = vld [vmem:[#allocation10 + $0x64] sm:$0xf]  ;;  %v897_v53 = vld [vmem:[#allocation10 + $0x70] sm:$0xf0]  ;;  %v924_v54 = vor.u32 %v1185_v45, %v921_v46 }
  0x2a   :  { %410 = vmatpush.bf16.msra.mxu2 %v932_v34  ;;  %423 = vmatpush.bf16.msra.mxu3 %v936_v38  ;;  %v903_v55 = vld [vmem:[#allocation10 + $0x68] sm:$0xf]  ;;  %v1183_v56 = vld [vmem:[#allocation10 + $0x74] sm:$0xf0]  ;;  %v1181_v57 = vld [vmem:[#allocation10 + $0x6c] sm:$0xf]  ;;  %v896_v59 = vor.u32 %v1182_v51, %v895_v49  ;;  %v900_v60 = vor.u32 %v1180_v52, %v897_v53 }
  0x2b   :  { %436 = vmatpush.bf16.msrb.mxu0 %v940_v42  ;;  %v905_v58 = vld [vmem:[#allocation10 + $0x78] sm:$0xf0]  ;;  %v879_v61 = vld [vmem:[#allocation10 + $0x40] sm:$0xf]  ;;  %v904_v62 = vor.u32 %v1183_v56, %v903_v55  ;;  %v1178_v63 = vld [vmem:[#allocation10 + $0x4c] sm:$0xf0] }
  0x2c   :  { %v1176_v0 = vld [vmem:[#allocation10 + $0x44] sm:$0xf]  ;;  %v881_v1 = vld [vmem:[#allocation10 + $0x50] sm:$0xf0]  ;;  %v908_v2 = vor.u32 %v1181_v57, %v905_v58  ;;  %v887_v3 = vld [vmem:[#allocation10 + $0x48] sm:$0xf]  ;;  %v880_v7 = vor.u32 %v1178_v63, %v879_v61 }
  0x2d   :  { %398 = vmatpush.bf16.msra.mxu1 %v912_v47  ;;  %v1179_v4 = vld [vmem:[#allocation10 + $0x54] sm:$0xf0]  ;;  %v1177_v5 = vld [vmem:[#allocation10 + $0x4c] sm:$0xf]  ;;  %v889_v6 = vld [vmem:[#allocation10 + $0x58] sm:$0xf0]  ;;  %v884_v8 = vor.u32 %v1176_v0, %v881_v1 }
  0x2e   :  { %411 = vmatpush.bf16.msra.mxu2 %v916_v48  ;;  %424 = vmatpush.bf16.msra.mxu3 %v920_v50  ;;  %v863_v9 = vld [vmem:[#allocation10 + $0x20] sm:$0xf]  ;;  %v1174_v10 = vld [vmem:[#allocation10 + $0x2c] sm:$0xf0]  ;;  %v888_v11 = vor.u32 %v1179_v4, %v887_v3  ;;  %v1172_v12 = vld [vmem:[#allocation10 + $0x24] sm:$0xf]  ;;  %v892_v15 = vor.u32 %v1177_v5, %v889_v6 }
  0x2f   :  { %437 = vmatpush.bf16.msrb.mxu0 %v924_v54  ;;  %v865_v13 = vld [vmem:[#allocation10 + $0x30] sm:$0xf0]  ;;  %v871_v14 = vld [vmem:[#allocation10 + $0x28] sm:$0xf]  ;;  %v1175_v16 = vld [vmem:[#allocation10 + $0x34] sm:$0xf0]  ;;  %v864_v22 = vor.u32 %v1174_v10, %v863_v9 }
  0x30   :  { %v1173_v17 = vld [vmem:[#allocation10 + $0x2c] sm:$0xf]  ;;  %v873_v18 = vld [vmem:[#allocation10 + $0x38] sm:$0xf0]  ;;  %v847_v19 = vld [vmem:[#allocation10] sm:$0xf]  ;;  %v868_v23 = vor.u32 %v1172_v12, %v865_v13  ;;  %v872_v27 = vor.u32 %v1175_v16, %v871_v14 }
  0x31   :  { %399 = vmatpush.bf16.msra.mxu1 %v896_v59  ;;  %v1170_v20 = vld [vmem:[#allocation10 + $0xc] sm:$0xf0]  ;;  %v1168_v21 = vld [vmem:[#allocation10 + $0x4] sm:$0xf]  ;;  %v849_v24 = vld [vmem:[#allocation10 + $0x10] sm:$0xf0]  ;;  %v876_v31 = vor.u32 %v1173_v17, %v873_v18 }
  0x32   :  { %412 = vmatpush.bf16.msra.mxu2 %v900_v60  ;;  %425 = vmatpush.bf16.msra.mxu3 %v904_v62  ;;  %v855_v25 = vld [vmem:[#allocation10 + $0x8] sm:$0xf]  ;;  %v1171_v26 = vld [vmem:[#allocation10 + $0x14] sm:$0xf0]  ;;  %v1169_v28 = vld [vmem:[#allocation10 + $0xc] sm:$0xf]  ;;  %v848_v37 = vor.u32 %v1170_v20, %v847_v19  ;;  %v852_v38 = vor.u32 %v1168_v21, %v849_v24 }
  0x33   :  { %438 = vmatpush.bf16.msrb.mxu0 %v908_v2  ;;  %v857_v29 = vld [vmem:[#allocation10 + $0x18] sm:$0xf0]  ;;  %v1087_v30 = vld [vmem:[#allocation12 + $0xe0] sm:$0xf]  ;;  %v1166_v32 = vld [vmem:[#allocation12 + $0xec] sm:$0xf0]  ;;  %v856_v41 = vor.u32 %v1171_v26, %v855_v25 }
  0x34   :  { %v1164_v33 = vld [vmem:[#allocation12 + $0xe4] sm:$0xf]  ;;  %v1089_v34 = vld [vmem:[#allocation12 + $0xf0] sm:$0xf0]  ;;  %v1095_v35 = vld [vmem:[#allocation12 + $0xe8] sm:$0xf]  ;;  %v1088_v42 = vor.u32 %v1166_v32, %v1087_v30  ;;  %v860_v43 = vor.u32 %v1169_v28, %v857_v29 }
  0x35   :  { %400 = vmatpush.bf16.msra.mxu1 %v880_v7  ;;  %v1167_v36 = vld [vmem:[#allocation12 + $0xf4] sm:$0xf0]  ;;  %v1165_v39 = vld [vmem:[#allocation12 + $0xec] sm:$0xf]  ;;  %v1097_v40 = vld [vmem:[#allocation12 + $0xf8] sm:$0xf0]  ;;  %v1092_v44 = vor.u32 %v1164_v33, %v1089_v34 }
  0x36   :  { %413 = vmatpush.bf16.msra.mxu2 %v884_v8  ;;  %426 = vmatpush.bf16.msra.mxu3 %v888_v11  ;;  %v1071_v45 = vld [vmem:[#allocation12 + $0xc0] sm:$0xf]  ;;  %v1162_v46 = vld [vmem:[#allocation12 + $0xcc] sm:$0xf0]  ;;  %v1096_v47 = vor.u32 %v1167_v36, %v1095_v35  ;;  %v1100_v48 = vor.u32 %v1165_v39, %v1097_v40  ;;  %v1160_v49 = vld [vmem:[#allocation12 + $0xc4] sm:$0xf] }
  0x37   :  { %439 = vmatpush.bf16.msrb.mxu0 %v892_v15  ;;  %v1073_v50 = vld [vmem:[#allocation12 + $0xd0] sm:$0xf0]  ;;  %v1079_v51 = vld [vmem:[#allocation12 + $0xc8] sm:$0xf]  ;;  %v1163_v52 = vld [vmem:[#allocation12 + $0xd4] sm:$0xf0]  ;;  %v1072_v55 = vor.u32 %v1162_v46, %v1071_v45 }
  0x38   :  { %v1161_v53 = vld [vmem:[#allocation12 + $0xcc] sm:$0xf]  ;;  %v1081_v54 = vld [vmem:[#allocation12 + $0xd8] sm:$0xf0]  ;;  %v1076_v56 = vor.u32 %v1160_v49, %v1073_v50  ;;  %v1080_v57 = vor.u32 %v1163_v52, %v1079_v51  ;;  %v1055_v59 = vld [vmem:[#allocation12 + $0xa0] sm:$0xf] }
  0x39   :  { %401 = vmatpush.bf16.msra.mxu1 %v864_v22  ;;  %v1084_v58 = vor.u32 %v1161_v53, %v1081_v54  ;;  %v1158_v60 = vld [vmem:[#allocation12 + $0xac] sm:$0xf0]  ;;  %v1156_v61 = vld [vmem:[#allocation12 + $0xa4] sm:$0xf]  ;;  %v1057_v63 = vld [vmem:[#allocation12 + $0xb0] sm:$0xf0] }
  0x3a   :  { %414 = vmatpush.bf16.msra.mxu2 %v868_v23  ;;  %427 = vmatpush.bf16.msra.mxu3 %v872_v27  ;;  %v1056_v62 = vor.u32 %v1158_v60, %v1055_v59  ;;  %v1063_v0 = vld [vmem:[#allocation12 + $0xa8] sm:$0xf]  ;;  %v1159_v1 = vld [vmem:[#allocation12 + $0xb4] sm:$0xf0]  ;;  %v1060_v2 = vor.u32 %v1156_v61, %v1057_v63  ;;  %v1157_v4 = vld [vmem:[#allocation12 + $0xac] sm:$0xf] }
  0x3b   :  { %440 = vmatpush.bf16.msrb.mxu0 %v876_v31  ;;  %v1064_v3 = vor.u32 %v1159_v1, %v1063_v0  ;;  %v1065_v5 = vld [vmem:[#allocation12 + $0xb8] sm:$0xf0]  ;;  %v1039_v7 = vld [vmem:[#allocation12 + $0x80] sm:$0xf]  ;;  %v1154_v8 = vld [vmem:[#allocation12 + $0x8c] sm:$0xf0] }
  0x3c   :  { %v1068_v6 = vor.u32 %v1157_v4, %v1065_v5  ;;  %v1152_v9 = vld [vmem:[#allocation12 + $0x84] sm:$0xf]  ;;  %v1040_v10 = vor.u32 %v1154_v8, %v1039_v7  ;;  %v1041_v11 = vld [vmem:[#allocation12 + $0x90] sm:$0xf0]  ;;  %v1047_v12 = vld [vmem:[#allocation12 + $0x88] sm:$0xf] }
  0x3d   :  { %402 = vmatpush.bf16.msra.mxu1 %v848_v37  ;;  %v1155_v13 = vld [vmem:[#allocation12 + $0x94] sm:$0xf0]  ;;  %v1044_v14 = vor.u32 %v1152_v9, %v1041_v11  ;;  %v1153_v16 = vld [vmem:[#allocation12 + $0x8c] sm:$0xf]  ;;  %v1049_v17 = vld [vmem:[#allocation12 + $0x98] sm:$0xf0] }
  0x3e   :  { %415 = vmatpush.bf16.msra.mxu2 %v852_v38  ;;  %428 = vmatpush.bf16.msra.mxu3 %v856_v41  ;;  %v1048_v15 = vor.u32 %v1155_v13, %v1047_v12  ;;  %v1052_v18 = vor.u32 %v1153_v16, %v1049_v17  ;;  %v1023_v19 = vld [vmem:[#allocation12 + $0x60] sm:$0xf]  ;;  %v1150_v20 = vld [vmem:[#allocation12 + $0x6c] sm:$0xf0]  ;;  %v1148_v21 = vld [vmem:[#allocation12 + $0x64] sm:$0xf] }
  0x3f   :  { %441 = vmatpush.bf16.msrb.mxu0 %v860_v43  ;;  %v1024_v22 = vor.u32 %v1150_v20, %v1023_v19  ;;  %v1025_v23 = vld [vmem:[#allocation12 + $0x70] sm:$0xf0]  ;;  %v1031_v24 = vld [vmem:[#allocation12 + $0x68] sm:$0xf]  ;;  %v1151_v25 = vld [vmem:[#allocation12 + $0x74] sm:$0xf0] }
  0x40   :  { %v1028_v26 = vor.u32 %v1148_v21, %v1025_v23  ;;  %v1032_v27 = vor.u32 %v1151_v25, %v1031_v24  ;;  %v1149_v28 = vld [vmem:[#allocation12 + $0x6c] sm:$0xf]  ;;  %v1033_v29 = vld [vmem:[#allocation12 + $0x78] sm:$0xf0]  ;;  %v1007_v30 = vld [vmem:[#allocation12 + $0x40] sm:$0xf] }
  0x41   :  { %607 = vmatpush.bf16.msrb.mxu1 %v1088_v42  ;;  %v1036_v31 = vor.u32 %v1149_v28, %v1033_v29  ;;  %v1146_v32 = vld [vmem:[#allocation12 + $0x4c] sm:$0xf0]  ;;  %v1144_v33 = vld [vmem:[#allocation12 + $0x44] sm:$0xf]  ;;  %v1009_v34 = vld [vmem:[#allocation12 + $0x50] sm:$0xf0] }
  0x42   :  { %620 = vmatpush.bf16.msrb.mxu2 %v1092_v44  ;;  %633 = vmatpush.bf16.msrb.mxu3 %v1096_v47  ;;  %v1008_v35 = vor.u32 %v1146_v32, %v1007_v30  ;;  %v1012_v36 = vor.u32 %v1144_v33, %v1009_v34  ;;  %v1015_v37 = vld [vmem:[#allocation12 + $0x48] sm:$0xf]  ;;  %v1147_v38 = vld [vmem:[#allocation12 + $0x54] sm:$0xf0]  ;;  %v1145_v39 = vld [vmem:[#allocation12 + $0x4c] sm:$0xf] }
  0x43   :  { %646 = vmatpush.bf16.msra.mxu0 %v1100_v48  ;;  %v1016_v40 = vor.u32 %v1147_v38, %v1015_v37  ;;  %v1017_v41 = vld [vmem:[#allocation12 + $0x58] sm:$0xf0]  ;;  %v991_v42 = vld [vmem:[#allocation12 + $0x20] sm:$0xf]  ;;  %v1142_v43 = vld [vmem:[#allocation12 + $0x2c] sm:$0xf0] }
  0x44   :  { %v1020_v44 = vor.u32 %v1145_v39, %v1017_v41  ;;  %v1140_v45 = vld [vmem:[#allocation12 + $0x24] sm:$0xf]  ;;  %v993_v46 = vld [vmem:[#allocation12 + $0x30] sm:$0xf0]  ;;  %v999_v47 = vld [vmem:[#allocation12 + $0x28] sm:$0xf]  ;;  %v992_v48 = vor.u32 %v1142_v43, %v991_v42 }
  0x45   :  { %608 = vmatpush.bf16.msrb.mxu1 %v1072_v55  ;;  %v1143_v49 = vld [vmem:[#allocation12 + $0x34] sm:$0xf0]  ;;  %v1141_v50 = vld [vmem:[#allocation12 + $0x2c] sm:$0xf]  ;;  %v1001_v51 = vld [vmem:[#allocation12 + $0x38] sm:$0xf0]  ;;  %v996_v52 = vor.u32 %v1140_v45, %v993_v46 }
  0x46   :  { %621 = vmatpush.bf16.msrb.mxu2 %v1076_v56  ;;  %634 = vmatpush.bf16.msrb.mxu3 %v1080_v57  ;;  %v1000_v53 = vor.u32 %v1143_v49, %v999_v47  ;;  %v975_v54 = vld [vmem:[#allocation12] sm:$0xf]  ;;  %v1138_v55 = vld [vmem:[#allocation12 + $0xc] sm:$0xf0]  ;;  %v1136_v56 = vld [vmem:[#allocation12 + $0x4] sm:$0xf]  ;;  %v1004_v57 = vor.u32 %v1141_v50, %v1001_v51 }
  0x47   :  { %647 = vmatpush.bf16.msra.mxu0 %v1084_v58  ;;  %v977_v58 = vld [vmem:[#allocation12 + $0x10] sm:$0xf0]  ;;  %v983_v59 = vld [vmem:[#allocation12 + $0x8] sm:$0xf]  ;;  %v1139_v60 = vld [vmem:[#allocation12 + $0x14] sm:$0xf0]  ;;  %v976_v0 = vor.u32 %v1138_v55, %v975_v54 }
  0x48   :  { %v1137_v61 = vld [vmem:[#allocation12 + $0xc] sm:$0xf]  ;;  %v1522_v63 = vld [vmem:[#allocation7] sm:$0xff]  ;;  %v1220_v5 = vld [vmem:[%s1545_s3] ss:$0 sm:$0xff]  ;;  %s1447_s29 = smov [#allocation15]  }
  0x49   :  { %609 = vmatpush.bf16.msrb.mxu1 %v1056_v62  ;;  %v985_v62 = vld [vmem:[#allocation12 + $0x18] sm:$0xf0]  ;;  %v134_v1 = vpack.c.bf16 %v1522_v63, %v1522_v63  ;;  %v1206_v16 = vld [vmem:[#allocation13 + $0x30] sm:$0xff]  ;;  %v1205_v20 = vld [vmem:[#allocation13 + $0x28] sm:$0xff]  ;;  %s809_s30 = sshll.u32 %s1447_s29, 4  ;;  %s811_s12 = sshll.u32 %s1551_s9, 4  ;;  %s810_s30 = int_to_ptr.vmem [resolvable:$true] %s809_s30  ;;  %s812_s12 = int_to_ptr.hbm [resolvable:$true] %s811_s12 }
  0x4a   :  { %622 = vmatpush.bf16.msrb.mxu2 %v1060_v2  ;;  %635 = vmatpush.bf16.msrb.mxu3 %v1064_v3  ;;  %v980_v2 = vor.u32 %v1136_v56, %v977_v58  ;;  %v984_v3 = vor.u32 %v1139_v60, %v983_v59  ;;  %v988_v4 = vor.u32 %v1137_v61, %v985_v62  ;;  %v659_v21 = vld [vmem:[%s1548_s6] sm:$0xf]  ;;  %v1203_v29 = vld [vmem:[#allocation13 + $0x18] sm:$0xff]  ;;  %v1202_v33 = vld [vmem:[#allocation13 + $0x10] sm:$0xff]  ;;  %s1446_s6 = smov [#allocation16]  }
  0x4b   :  { %648 = vmatpush.bf16.msra.mxu0 %v1068_v6  ;;  %135 = vst [vmem:[#allocation3] sm:$0xf] %v134_v1  ;;  %v1204_v23 = vld [vmem:[#allocation13 + $0x20] sm:$0xff]  ;;  %v661_v25 = vperm.slane %v659_v21, 0  ;;  %v662_v32 = vperm.slane %v659_v21, 1  ;;  %v1201_v38 = vld [vmem:[#allocation13 + $0x8] sm:$0xff] }
  0x4c   :  { %v1200_v42 = vld [vmem:[#allocation13] sm:$0xff]  ;;  %v663_v59 = vperm.slane %v659_v21, 2  ;;  %s820_s24 = sshll.u32 %s1446_s6, 4  ;;  %s821_s24 = int_to_ptr.vmem [resolvable:$true] %s820_s24 }
  0x4d   :  { %610 = vmatpush.bf16.msrb.mxu1 %v1040_v10 }
  0x4e   :  { %623 = vmatpush.bf16.msrb.mxu2 %v1044_v14  ;;  %636 = vmatpush.bf16.msrb.mxu3 %v1048_v15  ;;  %v1207_v14 = vld [vmem:[#allocation13 + $0x38] sm:$0xff] }
  0x4f   :  { %649 = vmatpush.bf16.msra.mxu0 %v1052_v18 }
  0x51   :  { %611 = vmatpush.bf16.msrb.mxu1 %v1024_v22 }
  0x52   :  { %624 = vmatpush.bf16.msrb.mxu2 %v1028_v26  ;;  %637 = vmatpush.bf16.msrb.mxu3 %v1032_v27  ;;  %v137_v11 = vld [vmem:[#allocation3] sm:$0xf] }
  0x53   :  { %650 = vmatpush.bf16.msra.mxu0 %v1036_v31 }
  0x55   :  { %612 = vmatpush.bf16.msrb.mxu1 %v1008_v35 }
  0x56   :  { %625 = vmatpush.bf16.msrb.mxu2 %v1012_v36  ;;  %638 = vmatpush.bf16.msrb.mxu3 %v1016_v40 }
  0x57   :  { %651 = vmatpush.bf16.msra.mxu0 %v1020_v44 }
  0x59   :  { %613 = vmatpush.bf16.msrb.mxu1 %v992_v48 }
  0x5a   :  { %626 = vmatpush.bf16.msrb.mxu2 %v996_v52  ;;  %639 = vmatpush.bf16.msrb.mxu3 %v1000_v53  ;;  %v664_v52 = vperm.slane %v659_v21, 3 }
  0x5b   :  { %652 = vmatpush.bf16.msra.mxu0 %v1004_v57 }
  0x5d   :  { %614 = vmatpush.bf16.msrb.mxu1 %v976_v0 }
  0x5e   :  { %627 = vmatpush.bf16.msrb.mxu2 %v980_v2  ;;  %640 = vmatpush.bf16.msrb.mxu3 %v984_v3 }
  0x5f   :  { %653 = vmatpush.bf16.msra.mxu0 %v988_v4 }
  0x9e   :  { %v165_v6 = vpop.f32.mrf.mxu0 }
  0x9f   :  { %v166_v7 = vadd.f32 %v1220_v5, %v165_v6 }
  0xa1   :  { %v169_v8 = vmax.f32 %v166_v7, 0.0 }
  0xa3   :  { %v170_v9 = vpack.c.bf16 %v169_v8, %v169_v8 }
  0xa5   :  { %403 = vmatmul.bf16.vlgmr.msra.gmra.mxu1 %v170_v9  ;;  %416 = vmatmul.bf16.vlgmr.msra.gmra.mxu2 %v170_v9 }
  0xa6   :  { %429 = vmatmul.bf16.vlgmr.msra.gmra.mxu3 %v170_v9  ;;  %442 = vmatmul.bf16.vlgmr.msrb.gmra.mxu0 %v170_v9  ;;  %v167_v10 = vpop.f32.mrf.mxu0 }
  0xa7   :  { %787 = vmatpush.bf16.msra.mxu1 %v1207_v14 }
  0xab   :  { %788 = vmatpush.bf16.msra.mxu1 %v1206_v16 }
  0xaf   :  { %789 = vmatpush.bf16.msra.mxu1 %v1205_v20  ;;  %v1221_v20 = vld [vmem:[%s1550_s8] ss:$0 sm:$0xff] }
  0xb3   :  { %790 = vmatpush.bf16.msra.mxu1 %v1204_v23 }
  0xb5   :  { %615 = vmatmul.bf16.vlgmr.msrb.gmra.mxu1 %v137_v11  ;;  %628 = vmatmul.bf16.vlgmr.msrb.gmra.mxu2 %v137_v11 }
  0xb6   :  { %641 = vmatmul.bf16.vlgmr.msrb.gmra.mxu3 %v137_v11  ;;  %654 = vmatmul.bf16.vlgmr.msra.gmra.mxu0 %v137_v11 }
  0xb7   :  { %791 = vmatpush.bf16.msra.mxu1 %v1203_v29 }
  0xbb   :  { %792 = vmatpush.bf16.msra.mxu1 %v1202_v33 }
  0xbf   :  { %793 = vmatpush.bf16.msra.mxu1 %v1201_v38 }
  0xc3   :  { %794 = vmatpush.bf16.msra.mxu1 %v1200_v42 }
 0x122   :  { %v404_v12 = vpop.f32.mrf.mxu1 }
 0x123   :  { %v443_v13 = vpop.f32.mrf.mxu0 }
 0x128   :  { %v417_v15 = vpop.f32.mrf.mxu2 }
 0x129   :  { %v430_v17 = vpop.f32.mrf.mxu3 }
 0x12a   :  { %v406_v18 = vpop.f32.mrf.mxu1 }
 0x12b   :  { %v445_v19 = vpop.f32.mrf.mxu0 }
 0x130   :  { %v419_v22 = vpop.f32.mrf.mxu2 }
 0x131   :  { %v432_v24 = vpop.f32.mrf.mxu3 }
 0x132   :  { %v616_v26 = vpop.f32.mrf.mxu1 }
 0x133   :  { %v617_v27 = vadd.f32 %v616_v26, %v404_v12  ;;  %v655_v28 = vpop.f32.mrf.mxu0 }
 0x134   :  { %v656_v54 = vadd.f32 %v655_v28, %v443_v13 }
 0x135   :  { %v669_v30 = vadd.f32 %v661_v25, %v617_v27 }
 0x136   :  { %v672_v0 = vadd.f32 %v664_v52, %v656_v54 }
 0x137   :  { %v1101_v31 = vmul.f32 -1.442695, %v669_v30 }
 0x138   :  { %v629_v34 = vpop.f32.mrf.mxu2 }
 0x139   :  { %1222 = vpow2.f32 %v1101_v31  ;;  %v630_v35 = vadd.f32 %v629_v34, %v417_v15  ;;  %v642_v36 = vpop.f32.mrf.mxu3 }
 0x13a   :  { %v618_v37 = vpop.f32.mrf.mxu1  ;;  %v643_v58 = vadd.f32 %v642_v36, %v430_v17 }
 0x13b   :  { %v670_v39 = vadd.f32 %v662_v32, %v630_v35  ;;  %v657_v40 = vpop.f32.mrf.mxu0 }
 0x13c   :  { %v671_v4 = vadd.f32 %v663_v59, %v643_v58 }
 0x13d   :  { %v1102_v41 = vmul.f32 -1.442695, %v670_v39 }
 0x13f   :  { %v1223_v43 = vpop.eup %1222  ;;  %1224 = vpow2.f32 %v1102_v41 }
 0x140   :  { %v676_v44 = vadd.f32 1.0, %v1223_v43  ;;  %v631_v45 = vpop.f32.mrf.mxu2 }
 0x141   :  { %v644_v46 = vpop.f32.mrf.mxu3 }
 0x142   :  { %1226 = vrcp.f32 %v676_v44  ;;  %v688_v53 = vand.u32 2147483648, %v676_v44  ;;  %v686_v56 = vand.u32 2147483647, %v676_v44  ;;  %vm682_vm2 = vweird.f32 %v676_v44 }
 0x144   :  { %v689_v62 = vor.u32 1.1754944e-38, %v688_v53  ;;  %vm687_vm4 = vcmp.eq.f32.partialorder %v686_v56, 8.507059e+37 }
 0x145   :  { %v1225_v47 = vpop.eup %1224 }
 0x146   :  { %v695_v48 = vadd.f32 1.0, %v1225_v47 }
 0x148   :  { %v1227_v49 = vpop.eup %1226  ;;  %1228 = vrcp.f32 %v695_v48  ;;  %v707_v7 = vand.u32 2147483648, %v695_v48  ;;  %v705_v8 = vand.u32 2147483647, %v695_v48  ;;  %vm701_vm6 = vweird.f32 %v695_v48 }
 0x149   :  { %v678_v50 = vmul.f32 %v1227_v49, %v676_v44  ;;  %vm683_vm1 = vweird.f32 %v1227_v49 }
 0x14a   :  { %vm684_vm3 = vmor %vm682_vm2, %vm683_vm1  ;;  %v708_v12 = vor.u32 1.1754944e-38, %v707_v7  ;;  %vm706_vm8 = vcmp.eq.f32.partialorder %v705_v8, 8.507059e+37 }
 0x14b   :  { %v679_v51 = vsub.f32 1.0, %v678_v50 }
 0x14d   :  { %v680_v55 = vmul.f32 %v1227_v49, %v679_v51 }
 0x14e   :  { %v1229_v57 = vpop.eup %1228 }
 0x14f   :  { %v681_v60 = vadd.f32 %v1227_v49, %v680_v55  ;;  %v697_v61 = vmul.f32 %v1229_v57, %v695_v48  ;;  %vm702_vm5 = vweird.f32 %v1229_v57 }
 0x150   :  { %vm703_vm7 = vmor %vm701_vm6, %vm702_vm5 }
 0x151   :  { %v685_v1 = vsel %vm684_vm3, %v1227_v49, %v681_v60  ;;  %v698_v2 = vsub.f32 1.0, %v697_v61 }
 0x152   :  { %v690_v3 = vsel %vm687_vm4, %v689_v62, %v685_v1 }
 0x153   :  { %v711_v5 = vmul.f32 %v690_v3, %v672_v0  ;;  %v699_v6 = vmul.f32 %v1229_v57, %v698_v2 }
 0x155   :  { %v712_v9 = vadd.f32 %v711_v5, %v671_v4  ;;  %v700_v10 = vadd.f32 %v1229_v57, %v699_v6 }
 0x157   :  { %1230 = vtanh.f32 %v712_v9  ;;  %v704_v11 = vsel %vm703_vm7, %v1229_v57, %v700_v10 }
 0x158   :  { %v709_v13 = vsel %vm706_vm8, %v708_v12, %v704_v11 }
 0x159   :  { %v714_v14 = vsub.f32 1.0, %v709_v13  ;;  %v716_v17 = vmul.f32 %v709_v13, %v1522_v63 }
 0x15d   :  { %v1231_v15 = vpop.eup %1230 }
 0x15e   :  { %v715_v16 = vmul.f32 %v1231_v15, %v714_v14 }
 0x160   :  { %v717_v18 = vadd.f32 %v716_v17, %v715_v16 }
 0x162   :  { %v718_v19 = vpack.c.bf16 %v717_v18, %v717_v18  ;;  %801 = vst [vmem:[#allocation16] sm:$0xff] %v717_v18 }
 0x163   :  { %825 = dma.vmem_to_hbm [thread:$0]  %s821_s24, 128, %s823_s1, [#allocation17]  }
 0x164   :  { %795 = vmatmul.bf16.vlgmr.msra.gmra.mxu1 %v718_v19  ;;  %803 = vst [vmem:[#allocation3] sm:$0xf] %v718_v19 }
 0x1e1   :  { %v796_v63 = vpop.f32.mrf.mxu1 }
 0x1e2   :  { %v797_v21 = vadd.f32 %v1221_v20, %v796_v63 }
 0x1e4   :  { %800 = vst [vmem:[#allocation15] sm:$0xff] %v797_v21 }
 0x1e5   :  { %814 = dma.vmem_to_hbm [thread:$0]  %s810_s30, 128, %s812_s12, [#allocation6]  }
 0x1e9   :  { %v798_v22 = vpop.f32.mrf.mxu1 }
 0x1ea   :  { %1432 = dma.done.wait [#allocation6], 128  }
 0x1eb   :  { %1433 = vsyncadd [#allocation6], 4294967168 }
 0x1ec   :  { %1434 = dma.done.wait [#allocation17], 128  }
 0x1ed   :  { %1435 = vsyncadd [#allocation17], 4294967168 }
 0x1ee   :  { %834 = vsyncpa [#allocation5], 1 }
 0x1ef   :  { %835 = vsyncpa [#allocation8], 1 }
 0x1f0   :  { %836 = vsyncpa [#allocation11], 1 }
 0x1f1   :  { %837 = vsyncpa [#allocation14], 1 }
 0x1f2   :  { %838 = vsyncpa [#allocation6], 1 }
 0x1f3   :  { %839 = vsyncpa [#allocation17], 1 }

</bundles_post_ra>
